<compile_context>
chip_gen: v6e
topology: v6e:2x2x1
jax: 0.10.0
libtpu: 0.0.40
codegen_flags: <defaults>
</compile_context>

<pallas_src>
import functools

import jax
import jax.numpy as jnp
from jax.experimental import pallas as pl
from jax.experimental.pallas import tpu as pltpu


def _round_up(x, m):
    return ((x + m - 1) // m) * m


def _make_mlp_kernel(num_layers):
    """Kernel computing the full MLP on one row-tile of x.

    refs = (x_ref, w0, b0, w1, b1, ..., w{L-1}, b{L-1}, o_ref)
    """

    def kernel(*refs):
        x_ref = refs[0]
        o_ref = refs[-1]
        param_refs = refs[1:-1]

        compute_dtype = x_ref.dtype
        h = x_ref[...]                      # native dtype feed into the MXU
        acc = None
        for i in range(num_layers):
            w = param_refs[2 * i][...]      # (in, out), native dtype
            b = param_refs[2 * i + 1][...]  # (1, out)
            acc = jnp.dot(h, w, preferred_element_type=jnp.float32)
            acc = acc + b.astype(jnp.float32)
            if i < num_layers - 1:
                acc = jnp.maximum(acc, 0.0)           # F.relu on hidden layers
                h = acc.astype(compute_dtype)          # native-dtype MXU feed
        o_ref[...] = acc.astype(o_ref.dtype)

    return kernel


def init_mlp_params(key, input_dim, hidden_dim, output_dim, num_layers,
                    dtype=jnp.float32):
    """Deterministic init matching the PyTorch module's layer shapes.

    Returns a list of (W, b) with W of shape (in, out) -- the transpose of
    torch's nn.Linear weight -- and b of shape (1, out).
    """
    h = [hidden_dim] * (num_layers - 1)
    dims_in = [input_dim] + h
    dims_out = h + [output_dim]
    params = []
    for n, k in zip(dims_in, dims_out):
        key, kw, kb = jax.random.split(key, 3)
        bound = 1.0 / (n ** 0.5)  # mimics torch.nn.Linear default init range
        w = jax.random.uniform(kw, (n, k), dtype=dtype, minval=-bound, maxval=bound)
        b = jax.random.uniform(kb, (1, k), dtype=dtype, minval=-bound, maxval=bound)
        params.append((w, b))
    return params


@functools.partial(jax.jit, static_argnames=("num_layers", "tile_m"))
def mlp_forward(x, params_flat, *, num_layers, tile_m=512):
    """x: (..., input_dim) -> (..., output_dim). Hot path runs in Pallas."""
    orig_shape = x.shape
    input_dim = orig_shape[-1]
    output_dim = params_flat[-2].shape[-1]
    itemsize = jnp.dtype(x.dtype).itemsize

    # ---- flatten token axes ------------------------------------------------
    m = 1
    for d in orig_shape[:-1]:
        m *= d
    x2d = x.reshape(m, input_dim)

    # ---- row tiling: large tiles, padded instead of asserted ---------------
    sub = {4: 8, 2: 16, 1: 32}.get(itemsize, 8)   # sublane multiple per dtype
    tm = max(sub, _round_up(min(tile_m, _round_up(m, sub)), sub))
    m_pad = _round_up(m, tm)
    grid_len = m_pad // tm
    # Keep >= 2 parallel grid steps when possible (v7x has 2 TensorCores).
    if grid_len == 1 and tm >= 2 * sub:
        tm = _round_up(tm // 2, sub)
        m_pad = _round_up(m, tm)
        grid_len = m_pad // tm

    if m_pad != m:
        x2d = jnp.pad(x2d, ((0, m_pad - m), (0, 0)))

    # ---- lane-dense output: pad output_dim (and last W/b) to multiple 128 --
    out_pad = _round_up(output_dim, 128)
    params_flat = list(params_flat)
    if out_pad != output_dim:
        w_last = params_flat[-2]
        b_last = params_flat[-1]
        params_flat[-2] = jnp.pad(w_last, ((0, 0), (0, out_pad - output_dim)))
        params_flat[-1] = jnp.pad(b_last, ((0, 0), (0, out_pad - output_dim)))

    # ---- specs --------------------------------------------------------------
    in_specs = [pl.BlockSpec((tm, input_dim), lambda i: (i, 0))]
    # Weights & biases: grid-invariant VMEM residents (no per-step pipelining).
    for _ in params_flat:
        in_specs.append(pl.BlockSpec(memory_space=pltpu.MemorySpace.VMEM))
    out_spec = pl.BlockSpec((tm, out_pad), lambda i: (i, 0))

    # ---- VMEM budget (double-buffered x / out tiles + params + activations) -
    hidden_dims = [p.shape[-1] for p in params_flat[0::2]]
    max_feat = max([input_dim, out_pad] + hidden_dims)
    vmem_est = (
        2 * tm * input_dim * itemsize            # double-buffered x tile
        + 2 * tm * out_pad * itemsize            # double-buffered out tile
        + sum(int(p.size) * jnp.dtype(p.dtype).itemsize for p in params_flat)
        + 4 * tm * max_feat * 4                  # live f32 activations, headroom
    )
    cp_kwargs = dict(dimension_semantics=("parallel",))
    if vmem_est > 32 * 1024 * 1024:
        cp_kwargs["vmem_limit_bytes"] = int(vmem_est)

    out2d = pl.pallas_call(
        _make_mlp_kernel(num_layers),
        out_shape=jax.ShapeDtypeStruct((m_pad, out_pad), x.dtype),
        grid_spec=pltpu.PrefetchScalarGridSpec(
            num_scalar_prefetch=0,
            grid=(grid_len,),
            in_specs=in_specs,
            out_specs=out_spec,
        ),
        compiler_params=pltpu.CompilerParams(**cp_kwargs),
    )(x2d, *params_flat)

    out2d = out2d[:m, :output_dim]
    return out2d.reshape(*orig_shape[:-1], output_dim)


def mlp_reference(x, params):
    """Pure-JAX reference matching the PyTorch forward."""
    h = x
    n = len(params)
    for i, (w, b) in enumerate(params):
        h = h @ w + b[0]
        if i < n - 1:
            h = jnp.maximum(h, 0.0)
    return h


if __name__ == "__main__":
    # Small shapes consistent with the module (bbox-head style usage):
    batch, seq = 2, 8
    input_dim, hidden_dim, output_dim, num_layers = 16, 32, 8, 3

    key = jax.random.PRNGKey(0)
    key, kx = jax.random.split(key)
    x = jax.random.normal(kx, (batch, seq, input_dim), dtype=jnp.float32)

    params = init_mlp_params(key, input_dim, hidden_dim, output_dim, num_layers)
    params_flat = tuple(p for wb in params for p in wb)

    out = mlp_forward(x, params_flat, num_layers=num_layers)
    out = jax.block_until_ready(out)

    ref = mlp_reference(x, params)
    assert out.shape == (batch, seq, output_dim), out.shape
    assert jnp.allclose(out, ref, atol=1e-5, rtol=1e-5), "mismatch vs reference"

    print("KERNEL_OK")
</pallas_src>

<mosaic_0001>
module attributes {stable_mosaic.version = 11 : i64} {
  func.func @kernel(%arg0: i32, %arg1: memref<8x16xf32, #tpu.memory_space<vmem>>, %arg2: memref<16x32xf32, #tpu.memory_space<vmem>>, %arg3: memref<1x32xf32, #tpu.memory_space<vmem>>, %arg4: memref<32x32xf32, #tpu.memory_space<vmem>>, %arg5: memref<1x32xf32, #tpu.memory_space<vmem>>, %arg6: memref<32x128xf32, #tpu.memory_space<vmem>>, %arg7: memref<1x128xf32, #tpu.memory_space<vmem>>, %arg8: memref<8x128xf32, #tpu.memory_space<vmem>>) attributes {dimension_semantics = [#tpu.dimension_semantics<parallel>], iteration_bounds = array<i64: 2>, scalar_prefetch = 0 : i64, scratch_operands = 0 : i64, tpu.core_type = #tpu.core_type<tc>, window_params = [{transform_indices = @transform_0, window_bounds = array<i64: 8, 16>}, {pipeline_mode = #tpu.pipeline_mode<synchronous>, transform_indices = @transform_1, window_bounds = array<i64: 16, 32>}, {pipeline_mode = #tpu.pipeline_mode<synchronous>, transform_indices = @transform_2, window_bounds = array<i64: 1, 32>}, {pipeline_mode = #tpu.pipeline_mode<synchronous>, transform_indices = @transform_3, window_bounds = array<i64: 32, 32>}, {pipeline_mode = #tpu.pipeline_mode<synchronous>, transform_indices = @transform_4, window_bounds = array<i64: 1, 32>}, {pipeline_mode = #tpu.pipeline_mode<synchronous>, transform_indices = @transform_5, window_bounds = array<i64: 32, 128>}, {pipeline_mode = #tpu.pipeline_mode<synchronous>, transform_indices = @transform_6, window_bounds = array<i64: 1, 128>}, {transform_indices = @transform_7, window_bounds = array<i64: 8, 128>}]} {
    %c0 = arith.constant 0 : index
    %c0_0 = arith.constant 0 : index
    %0 = vector.load %arg1[%c0, %c0_0] : memref<8x16xf32, #tpu.memory_space<vmem>>, vector<8x16xf32>
    %c0_1 = arith.constant 0 : index
    %c0_2 = arith.constant 0 : index
    %1 = vector.load %arg2[%c0_1, %c0_2] : memref<16x32xf32, #tpu.memory_space<vmem>>, vector<16x32xf32>
    %c0_3 = arith.constant 0 : index
    %c0_4 = arith.constant 0 : index
    %2 = vector.load %arg3[%c0_3, %c0_4] : memref<1x32xf32, #tpu.memory_space<vmem>>, vector<1x32xf32>
    %cst = arith.constant dense<0.000000e+00> : vector<8x32xf32>
    %3 = tpu.matmul %0, %1, %cst {dimension_numbers = #tpu.dot_dimension_numbers<[1], [0], [0], [1], [0, 0, 1, 1], [], []>} : vector<8x16xf32>, vector<16x32xf32>, vector<8x32xf32> -> vector<8x32xf32>
    %4 = vector.broadcast %2 : vector<1x32xf32> to vector<8x32xf32>
    %5 = arith.addf %3, %4 : vector<8x32xf32>
    %cst_5 = arith.constant 0.000000e+00 : f32
    %6 = vector.broadcast %cst_5 : f32 to vector<8x32xf32>
    %7 = arith.maximumf %5, %6 : vector<8x32xf32>
    %c0_6 = arith.constant 0 : index
    %c0_7 = arith.constant 0 : index
    %8 = vector.load %arg4[%c0_6, %c0_7] : memref<32x32xf32, #tpu.memory_space<vmem>>, vector<32x32xf32>
    %c0_8 = arith.constant 0 : index
    %c0_9 = arith.constant 0 : index
    %9 = vector.load %arg5[%c0_8, %c0_9] : memref<1x32xf32, #tpu.memory_space<vmem>>, vector<1x32xf32>
    %cst_10 = arith.constant dense<0.000000e+00> : vector<8x32xf32>
    %10 = tpu.matmul %7, %8, %cst_10 {dimension_numbers = #tpu.dot_dimension_numbers<[1], [0], [0], [1], [0, 0, 1, 1], [], []>} : vector<8x32xf32>, vector<32x32xf32>, vector<8x32xf32> -> vector<8x32xf32>
    %11 = vector.broadcast %9 : vector<1x32xf32> to vector<8x32xf32>
    %12 = arith.addf %10, %11 : vector<8x32xf32>
    %cst_11 = arith.constant 0.000000e+00 : f32
    %13 = vector.broadcast %cst_11 : f32 to vector<8x32xf32>
    %14 = arith.maximumf %12, %13 : vector<8x32xf32>
    %c0_12 = arith.constant 0 : index
    %c0_13 = arith.constant 0 : index
    %15 = vector.load %arg6[%c0_12, %c0_13] : memref<32x128xf32, #tpu.memory_space<vmem>>, vector<32x128xf32>
    %c0_14 = arith.constant 0 : index
    %c0_15 = arith.constant 0 : index
    %16 = vector.load %arg7[%c0_14, %c0_15] : memref<1x128xf32, #tpu.memory_space<vmem>>, vector<1x128xf32>
    %cst_16 = arith.constant dense<0.000000e+00> : vector<8x128xf32>
    %17 = tpu.matmul %14, %15, %cst_16 {dimension_numbers = #tpu.dot_dimension_numbers<[1], [0], [0], [1], [0, 0, 1, 1], [], []>} : vector<8x32xf32>, vector<32x128xf32>, vector<8x128xf32> -> vector<8x128xf32>
    %18 = vector.broadcast %16 : vector<1x128xf32> to vector<8x128xf32>
    %19 = arith.addf %17, %18 : vector<8x128xf32>
    %c0_17 = arith.constant 0 : index
    %c0_18 = arith.constant 0 : index
    %20 = vector.load %arg8[%c0_17, %c0_18] : memref<8x128xf32, #tpu.memory_space<vmem>>, vector<8x128xf32>
    tpu.vector_store %arg8[%c0_17, %c0_18], %19 {strides = array<i32>} : memref<8x128xf32, #tpu.memory_space<vmem>>, vector<8x128xf32>,
    return
  }
  func.func @transform_0(%arg0: i32) -> (i32, i32) {
    %c0_i32 = arith.constant 0 : i32
    %c0_i32_0 = arith.constant 0 : i32
    return %arg0, %c0_i32 : i32, i32
  }
  func.func @transform_1(%arg0: i32) -> (i32, i32) {
    %c0_i32 = arith.constant 0 : i32
    %c0_i32_0 = arith.constant 0 : i32
    %c0_i32_1 = arith.constant 0 : i32
    return %c0_i32, %c0_i32_0 : i32, i32
  }
  func.func @transform_2(%arg0: i32) -> (i32, i32) {
    %c0_i32 = arith.constant 0 : i32
    %c0_i32_0 = arith.constant 0 : i32
    %c0_i32_1 = arith.constant 0 : i32
    return %c0_i32, %c0_i32_0 : i32, i32
  }
  func.func @transform_3(%arg0: i32) -> (i32, i32) {
    %c0_i32 = arith.constant 0 : i32
    %c0_i32_0 = arith.constant 0 : i32
    %c0_i32_1 = arith.constant 0 : i32
    return %c0_i32, %c0_i32_0 : i32, i32
  }
  func.func @transform_4(%arg0: i32) -> (i32, i32) {
    %c0_i32 = arith.constant 0 : i32
    %c0_i32_0 = arith.constant 0 : i32
    %c0_i32_1 = arith.constant 0 : i32
    return %c0_i32, %c0_i32_0 : i32, i32
  }
  func.func @transform_5(%arg0: i32) -> (i32, i32) {
    %c0_i32 = arith.constant 0 : i32
    %c0_i32_0 = arith.constant 0 : i32
    %c0_i32_1 = arith.constant 0 : i32
    return %c0_i32, %c0_i32_0 : i32, i32
  }
  func.func @transform_6(%arg0: i32) -> (i32, i32) {
    %c0_i32 = arith.constant 0 : i32
    %c0_i32_0 = arith.constant 0 : i32
    %c0_i32_1 = arith.constant 0 : i32
    return %c0_i32, %c0_i32_0 : i32, i32
  }
  func.func @transform_7(%arg0: i32) -> (i32, i32) {
    %c0_i32 = arith.constant 0 : i32
    %c0_i32_0 = arith.constant 0 : i32
    return %arg0, %c0_i32 : i32, i32
  }
}

</mosaic_0001>

<bundles_post_ra>
// kernel: mlp_forward.1
= control target key start
LH: loop header
LB: loop body
LE: loop exit
PB: predicated region body
PF: predicated region fallthrough
CT: control target
= control target key end

     0   :  { %s700_s24 = smov 0   ;;  %s768_s0 = inlined_call_operand.vmem [shape: f32[16,16], index: 0, kind: input, shape index: {}]   ;;  %s769_s1 = inlined_call_operand.vmem [shape: f32[16,32], index: 1, kind: input, shape index: {}]   ;;  %s770_s2 = inlined_call_operand.vmem [shape: f32[1,32], index: 2, kind: input, shape index: {}]   ;;  %s771_s3 = inlined_call_operand.vmem [shape: f32[32,32], index: 3, kind: input, shape index: {}]   ;;  %s772_s4 = inlined_call_operand.vmem [shape: f32[1,32], index: 4, kind: input, shape index: {}]   ;;  %s773_s5 = inlined_call_operand.vmem [shape: f32[32,128], index: 5, kind: input, shape index: {}]   ;;  %s774_s6 = inlined_call_operand.vmem [shape: f32[1,128], index: 6, kind: input, shape index: {}]   ;;  %s775_s7 = inlined_call_operand.vmem [shape: f32[16,128], index: 7, kind: output, shape index: {}]  }
   0x1 LB: > { %s583_s25 = sadd.s32 4294967295, %s656_s24   ;;  %p587_p0 = scmp.ge.s32.totalorder %s656_s24, 1  ;;  %s656_s24 = sphi %s700_s24, %s17_s24  }
   0x2   : > { %p236_p1 = scmp.lt.s32.totalorder %s656_s24, 3 }
   0x4   : > { %p237_p2 = pnand %p587_p0, %p236_p1 }
   0x5   : > { %p266_p3 = scmp.lt.s32.totalorder (!%p237_p2), %s583_s25, 1 }
   0x6   : > { %240 = sbr.rel (%p237_p2) target bundleno = 607 (0x25f), region = 48 }
   0xb   : > { %v276_v0 = vld [vmem:[%s769_s1 + $0x8] sm:$0xff]  ;;  %v658_v1 = vmov 0.0   ;;  %v275_v2 = vld [vmem:[%s769_s1] sm:$0xff]  ;;  %vm659_vm0 = vmmov 0   ;;  %v362_v3 = vld [vmem:[%s771_s3 + $0x18] sm:$0xff]  ;;  %s777_s25 = smov (!%p266_p3, %s583_s25), 1 }
   0xc   : > { %611 = vmatprep.subr.mxu0 %v658_v1  ;;  %615 = vmatprep.mubr.msk.f32.mxu0 %vm659_vm0, %v658_v1  ;;  %s588_s9 = sshll.u32 %s777_s25, 3  ;;  %vm284_vm1 = vcmask 130048   ;;  %v361_v5 = vld [vmem:[%s771_s3 + $0x10] sm:$0xff]  ;;  %v360_v6 = vld [vmem:[%s771_s3 + $0x8] sm:$0xff]  ;;  %v359_v7 = vld [vmem:[%s771_s3] sm:$0xff]  ;;  %vm370_vm2 = vcmask 261120  }
   0xd   : > { %612 = vmatpush3.msra.mxu0 %v276_v0  ;;  %618 = vmatprep.subr.mxu1 %v658_v1  ;;  %s269_s12 = scalar_lea.vmem %s768_s0, %s588_s9  ;;  %v448_v8 = vld [vmem:[%s773_s5 + $0x18] sm:$0xff]  ;;  %v590_v9 = vld [vmem:[%s770_s2] ss:$0 sm:$0xff]  ;;  %v447_v14 = vld [vmem:[%s773_s5 + $0x10] sm:$0xff]  ;;  %s273_s15 = scalar_lea.vmem %s775_s7, %s588_s9 }
   0xe   : > { %613 = vmatprep.subr.mxu0 %v658_v1  ;;  %619 = vmatpush3.msra.mxu1 %v362_v3  ;;  %v274_v4 = vld [vmem:[%s269_s12] sm:$0xff]  ;;  %v446_v15 = vld [vmem:[%s773_s5 + $0x8] sm:$0xff] }
   0xf   : > { %614 = vmatpush3.msra.mxu0 %v275_v2  ;;  %620 = vmatprep.subr.mxu1 %v658_v1  ;;  %v445_v16 = vld [vmem:[%s773_s5] sm:$0xff] }
  0x10   : > { %626 = vmatprep.mubr.msk.f32.mxu1 %vm659_vm0, %v658_v1  ;;  %629 = vmatprep.subr.mxu0 %v658_v1  ;;  %v592_v17 = vld [vmem:[%s772_s4] ss:$0 sm:$0xff] }
  0x11   : > { %616 = vmatmul.mubr.msk.f32.vlgmr.msra.gmra.mxu0 %vm284_vm1, %v274_v4  ;;  %621 = vmatpush3.msra.mxu1 %v361_v5  ;;  %v594_v22 = vld [vmem:[%s774_s6] ss:$0 sm:$0xff] }
  0x12   : > { %637 = vmatprep.mubr.msk.f32.mxu0 %vm659_vm0, %v658_v1  ;;  %622 = vmatprep.subr.mxu1 %v658_v1 }
  0x13   : > { %623 = vmatpush3.msra.mxu1 %v360_v6  ;;  %630 = vmatpush3.msra.mxu0 %v448_v8 }
  0x14   : > { %624 = vmatprep.subr.mxu1 %v658_v1  ;;  %631 = vmatprep.subr.mxu0 %v658_v1 }
  0x15   : > { %625 = vmatpush3.msra.mxu1 %v359_v7  ;;  %632 = vmatpush3.msra.mxu0 %v447_v14 }
  0x16   : > { %633 = vmatprep.subr.mxu0 %v658_v1 }
  0x17   : > { %634 = vmatpush3.msra.mxu0 %v446_v15 }
  0x18   : > { %635 = vmatprep.subr.mxu0 %v658_v1 }
  0x19   : > { %636 = vmatpush3.msra.mxu0 %v445_v16 }
  0xd1   : > { %v354_v10 = vpop.f32.mrf.mxu0 }
  0xd2   : > { %v355_v11 = vadd.f32 %v590_v9, %v354_v10 }
  0xd3   : > { %v617_v12 = vpop.f32.mrf.mxu0 }
  0xd4   : > { %v358_v13 = vmax.f32 %v355_v11, 0.0 }
  0xd6   : > { %627 = vmatmul.mubr.msk.f32.vlgmr.msra.gmra.mxu1 %vm370_vm2, %v358_v13 }
 0x196   : > { %v440_v18 = vpop.f32.mrf.mxu1 }
 0x197   : > { %v441_v19 = vadd.f32 %v592_v17, %v440_v18 }
 0x198   : > { %v628_v20 = vpop.f32.mrf.mxu1 }
 0x199   : > { %v444_v21 = vmax.f32 %v441_v19, 0.0 }
 0x19b   : > { %638 = vmatmul.mubr.msk.f32.vlgmr.msra.gmra.mxu0 %vm370_vm2, %v444_v21 }
 0x25b   : > { %v525_v23 = vpop.f32.mrf.mxu0 }
 0x25c   : > { %v526_v24 = vadd.f32 %v594_v22, %v525_v23 }
 0x25d   : > { %v639_v25 = vpop.f32.mrf.mxu0 }
 0x25e   : > { %529 = vst [vmem:[%s273_s15] sm:$0xff] %v526_v24 }
 0x25f PF: > { %s17_s24 = sadd.s32 1, %s656_s24  }
 0x260   : > { %p14_p4 = scmp.ge.s32.totalorder %s17_s24, 4  }
 0x262   :  { %16 = sbr.rel (!%p14_p4) target bundleno = 1 (0x1), region = 78 }

</bundles_post_ra>
